<compile_context>
chip_gen: v7x
topology: tpu7x:2x2x1
jax: 0.10.0
libtpu: 0.0.40
codegen_flags: <defaults>
</compile_context>

<pallas_src>
import jax
import jax.numpy as jnp
from jax.experimental import pallas as pl
from jax.experimental.pallas import tpu as pltpu

LN_EPS = 1e-5
OUT_DIM = 7     # true output width
OUT_PAD = 8     # stored output width (full-array last dim -> legal block dim)
W4_N = 128      # lane-dense padded width of the final matmul weight


def _cdiv(a, b):
    return -(-a // b)


def _round_up(a, m):
    return _cdiv(a, m) * m


def voting_net_kernel(
    x_ref,
    w1_ref, g1_ref, be1_ref,
    w2_ref, b2_ref,
    w3_ref, b3_ref,
    w4_ref, b4_ref,
    o_ref,
):
    # x arrives as f32 (bt, 27): 26 features + a constant-1 column that folds
    # the fc1 bias into the matmul. Cast to bf16 here (saves a wrapper pass).
    x = x_ref[...].astype(jnp.bfloat16)

    # fc1 (+ folded bias): bf16 MXU matmul, f32 accumulate.
    h1 = jnp.dot(x, w1_ref[...], preferred_element_type=jnp.float32)  # (bt, 384)

    # LayerNorm over 384 in f32 (single pass; clamp var for f32 cancellation).
    inv_n = 1.0 / h1.shape[-1]
    mean = jnp.sum(h1, axis=-1, keepdims=True) * inv_n
    mean_sq = jnp.sum(h1 * h1, axis=-1, keepdims=True) * inv_n
    var = jnp.maximum(mean_sq - mean * mean, 0.0)
    inv_std = jax.lax.rsqrt(var + LN_EPS)
    h1n = (h1 - mean) * inv_std * g1_ref[...] + be1_ref[...]
    # ReLU after the bf16 downcast: identical result (max-with-0 commutes with
    # bf16 rounding), half the VPU ops on bf16-capable VALUs (v6e/v7x).
    # Dropout(p=0.3) is identity in eval mode.
    # TODO(synk): training-mode dropout (Bernoulli mask via pltpu.prng_*) not implemented.
    h1b = jnp.maximum(h1n.astype(jnp.bfloat16), 0.0)

    # fc2 + ReLU
    h2 = jnp.dot(h1b, w2_ref[...], preferred_element_type=jnp.float32) + b2_ref[...]
    h2b = jnp.maximum(h2.astype(jnp.bfloat16), 0.0)

    # fc3 + ReLU
    h3 = jnp.dot(h2b, w3_ref[...], preferred_element_type=jnp.float32) + b3_ref[...]
    h3b = jnp.maximum(h3.astype(jnp.bfloat16), 0.0)

    # out: lane-dense (64,128) matmul, but only the 8 useful columns are
    # biased and stored (16x less writeback than a 128-wide f32 output).
    y = jnp.dot(h3b, w4_ref[...], preferred_element_type=jnp.float32)  # (bt, 128)
    o_ref[...] = y[:, :OUT_PAD] + b4_ref[...]


def _choose_tile(B, b_tile):
    ntiles = max(1, _cdiv(B, b_tile))
    if B >= 256:
        # >=2 grid steps so dimension_semantics=("parallel",) actually shards
        # the batch across both v7x TensorCores.
        ntiles = max(ntiles, 2)
    bt = _round_up(_cdiv(B, ntiles), 16)  # 16: bf16 sublane packing
    # MXU-friendly alignment only when the extra batch padding stays small.
    for align in (256, 128):
        cand = _round_up(bt, align)
        if (cand - bt) * ntiles <= max(64, B // 16):
            bt = cand
            break
    return bt, ntiles


def voting_net_forward(x, params, *, b_tile=1024):
    (w1, b1, g1, be1, w2, b2, w3, b3, w4, b4) = params
    B, f_in = x.shape

    # bf16 matmul operands. Fold b1 into w1 as an extra input row (x gets a
    # constant-1 column). Biases / LN affine stay f32.
    w1b = jnp.concatenate([w1, b1], axis=0).astype(jnp.bfloat16)      # (27, 384)
    w2b = w2.astype(jnp.bfloat16)
    w3b = w3.astype(jnp.bfloat16)
    w4p = jnp.zeros((w4.shape[0], W4_N), jnp.bfloat16).at[:, :OUT_DIM].set(
        w4.astype(jnp.bfloat16))
    b4p = jnp.zeros((1, OUT_PAD), jnp.float32).at[:, :OUT_DIM].set(b4)

    bt, ntiles = _choose_tile(B, b_tile)
    B_pad = bt * ntiles

    # Append the constant-1 bias column and pad the batch (fused cheaply by XLA).
    x_in = jnp.concatenate(
        [x.astype(jnp.float32), jnp.ones((B, 1), jnp.float32)], axis=1)
    if B_pad != B:
        x_in = jnp.pad(x_in, ((0, B_pad - B), (0, 0)))

    resident = lambda a: pl.BlockSpec(a.shape, lambda i: (0,) * a.ndim)
    weights = (w1b, g1, be1, w2b, b2, w3b, b3, w4p, b4p)

    out = pl.pallas_call(
        voting_net_kernel,
        out_shape=jax.ShapeDtypeStruct((B_pad, OUT_PAD), jnp.float32),
        grid=(ntiles,),
        in_specs=[pl.BlockSpec((bt, f_in + 1), lambda i: (i, 0))]
                 + [resident(a) for a in weights],
        out_specs=pl.BlockSpec((bt, OUT_PAD), lambda i: (i, 0)),
        compiler_params=pltpu.CompilerParams(
            dimension_semantics=("parallel",),
            vmem_limit_bytes=32 * 1024 * 1024,
        ),
    )(x_in, *weights)

    return out[:B, :OUT_DIM]


def init_params(key):
    # Deterministic synthetic init (uniform, PyTorch-Linear-style bounds), f32.
    ks = jax.random.split(key, 8)

    def linear(kw, kb, fan_in, fan_out):
        bound = 1.0 / jnp.sqrt(jnp.float32(fan_in))
        w = jax.random.uniform(kw, (fan_in, fan_out), jnp.float32, -bound, bound)
        b = jax.random.uniform(kb, (1, fan_out), jnp.float32, -bound, bound)
        return w, b

    w1, b1 = linear(ks[0], ks[1], 26, 384)
    g1 = jnp.ones((1, 384), jnp.float32)    # LayerNorm weight
    be1 = jnp.zeros((1, 384), jnp.float32)  # LayerNorm bias
    w2, b2 = linear(ks[2], ks[3], 384, 192)
    w3, b3 = linear(ks[4], ks[5], 192, 64)
    w4, b4 = linear(ks[6], ks[7], 64, 7)
    return (w1, b1, g1, be1, w2, b2, w3, b3, w4, b4)


def reference_forward(x, params):
    # Precision-matched reference: same bf16 dot inputs / f32 accumulation as
    # the kernel, LayerNorm in f32. (vs the full-f32 PyTorch module the
    # difference is just bf16 rounding, ~1% relative.)
    (w1, b1, g1, be1, w2, b2, w3, b3, w4, b4) = params
    bf = jnp.bfloat16
    h1 = jnp.dot(x.astype(bf), w1.astype(bf),
                 preferred_element_type=jnp.float32) + b1
    mean = h1.mean(-1, keepdims=True)
    var = ((h1 - mean) ** 2).mean(-1, keepdims=True)
    h1n = (h1 - mean) * jax.lax.rsqrt(var + LN_EPS) * g1 + be1
    h1n = jnp.maximum(h1n, 0.0)
    h2 = jnp.maximum(jnp.dot(h1n.astype(bf), w2.astype(bf),
                             preferred_element_type=jnp.float32) + b2, 0.0)
    h3 = jnp.maximum(jnp.dot(h2.astype(bf), w3.astype(bf),
                             preferred_element_type=jnp.float32) + b3, 0.0)
    return jnp.dot(h3.astype(bf), w4.astype(bf),
                   preferred_element_type=jnp.float32) + b4


if __name__ == "__main__":
    key = jax.random.PRNGKey(0)
    kx, kp = jax.random.split(key)
    B = 8
    x = jax.random.normal(kx, (B, 26), jnp.float32)
    params = init_params(kp)

    out = voting_net_forward(x, params)
    jax.block_until_ready(out)

    ref = reference_forward(x, params)
    assert out.shape == (B, OUT_DIM)
    assert jnp.allclose(out, ref, atol=1e-2, rtol=1e-2)
    print("KERNEL_OK")
</pallas_src>

<mosaic_0001>
module attributes {stable_mosaic.version = 11 : i64} {
  func.func @voting_net_kernel(%arg0: i32, %arg1: memref<16x27xf32, #tpu.memory_space<vmem>>, %arg2: memref<27x384xbf16, #tpu.memory_space<vmem>>, %arg3: memref<1x384xf32, #tpu.memory_space<vmem>>, %arg4: memref<1x384xf32, #tpu.memory_space<vmem>>, %arg5: memref<384x192xbf16, #tpu.memory_space<vmem>>, %arg6: memref<1x192xf32, #tpu.memory_space<vmem>>, %arg7: memref<192x64xbf16, #tpu.memory_space<vmem>>, %arg8: memref<1x64xf32, #tpu.memory_space<vmem>>, %arg9: memref<64x128xbf16, #tpu.memory_space<vmem>>, %arg10: memref<1x8xf32, #tpu.memory_space<vmem>>, %arg11: memref<16x8xf32, #tpu.memory_space<vmem>>) attributes {dimension_semantics = [#tpu.dimension_semantics<parallel>], iteration_bounds = array<i64: 1>, scalar_prefetch = 0 : i64, scratch_operands = 0 : i64, tpu.core_type = #tpu.core_type<tc>, window_params = [{transform_indices = @transform_0, window_bounds = array<i64: 16, 27>}, {pipeline_mode = #tpu.pipeline_mode<synchronous>, transform_indices = @transform_1, window_bounds = array<i64: 27, 384>}, {pipeline_mode = #tpu.pipeline_mode<synchronous>, transform_indices = @transform_2, window_bounds = array<i64: 1, 384>}, {pipeline_mode = #tpu.pipeline_mode<synchronous>, transform_indices = @transform_3, window_bounds = array<i64: 1, 384>}, {pipeline_mode = #tpu.pipeline_mode<synchronous>, transform_indices = @transform_4, window_bounds = array<i64: 384, 192>}, {pipeline_mode = #tpu.pipeline_mode<synchronous>, transform_indices = @transform_5, window_bounds = array<i64: 1, 192>}, {pipeline_mode = #tpu.pipeline_mode<synchronous>, transform_indices = @transform_6, window_bounds = array<i64: 192, 64>}, {pipeline_mode = #tpu.pipeline_mode<synchronous>, transform_indices = @transform_7, window_bounds = array<i64: 1, 64>}, {pipeline_mode = #tpu.pipeline_mode<synchronous>, transform_indices = @transform_8, window_bounds = array<i64: 64, 128>}, {pipeline_mode = #tpu.pipeline_mode<synchronous>, transform_indices = @transform_9, window_bounds = array<i64: 1, 8>}, {transform_indices = @transform_10, window_bounds = array<i64: 16, 8>}]} {
    %c0 = arith.constant 0 : index
    %c0_0 = arith.constant 0 : index
    %0 = vector.load %arg1[%c0, %c0_0] : memref<16x27xf32, #tpu.memory_space<vmem>>, vector<16x27xf32>
    %1 = arith.truncf %0 : vector<16x27xf32> to vector<16x27xbf16>
    %c0_1 = arith.constant 0 : index
    %c0_2 = arith.constant 0 : index
    %2 = vector.load %arg2[%c0_1, %c0_2] : memref<27x384xbf16, #tpu.memory_space<vmem>>, vector<27x384xbf16>
    %cst = arith.constant dense<0.000000e+00> : vector<16x384xf32>
    %3 = tpu.matmul %1, %2, %cst {dimension_numbers = #tpu.dot_dimension_numbers<[1], [0], [0], [1], [0, 0, 1, 1], [], []>} : vector<16x27xbf16>, vector<27x384xbf16>, vector<16x384xf32> -> vector<16x384xf32>
    %cst_3 = arith.constant dense<0.000000e+00> : vector<16xf32>
    %4 = vector.multi_reduction <add>, %3, %cst_3 [1] : vector<16x384xf32> to vector<16xf32>
    %5 = vector.shape_cast %4 : vector<16xf32> to vector<16x1xf32>
    %cst_4 = arith.constant 0.00260416674 : f32
    %6 = vector.broadcast %cst_4 : f32 to vector<16x1xf32>
    %7 = arith.mulf %5, %6 : vector<16x1xf32>
    %8 = arith.mulf %3, %3 : vector<16x384xf32>
    %cst_5 = arith.constant dense<0.000000e+00> : vector<16xf32>
    %9 = vector.multi_reduction <add>, %8, %cst_5 [1] : vector<16x384xf32> to vector<16xf32>
    %10 = vector.shape_cast %9 : vector<16xf32> to vector<16x1xf32>
    %cst_6 = arith.constant 0.00260416674 : f32
    %11 = vector.broadcast %cst_6 : f32 to vector<16x1xf32>
    %12 = arith.mulf %10, %11 : vector<16x1xf32>
    %13 = arith.mulf %7, %7 : vector<16x1xf32>
    %14 = arith.subf %12, %13 : vector<16x1xf32>
    %cst_7 = arith.constant 0.000000e+00 : f32
    %15 = vector.broadcast %cst_7 : f32 to vector<16x1xf32>
    %16 = arith.maximumf %14, %15 : vector<16x1xf32>
    %cst_8 = arith.constant 9.99999974E-6 : f32
    %17 = vector.broadcast %cst_8 : f32 to vector<16x1xf32>
    %18 = arith.addf %16, %17 : vector<16x1xf32>
    %19 = math.rsqrt %18 : vector<16x1xf32>
    %20 = vector.broadcast %7 : vector<16x1xf32> to vector<16x384xf32>
    %21 = arith.subf %3, %20 : vector<16x384xf32>
    %22 = vector.broadcast %19 : vector<16x1xf32> to vector<16x384xf32>
    %23 = arith.mulf %21, %22 : vector<16x384xf32>
    %c0_9 = arith.constant 0 : index
    %c0_10 = arith.constant 0 : index
    %24 = vector.load %arg3[%c0_9, %c0_10] : memref<1x384xf32, #tpu.memory_space<vmem>>, vector<1x384xf32>
    %25 = vector.broadcast %24 : vector<1x384xf32> to vector<16x384xf32>
    %26 = arith.mulf %23, %25 : vector<16x384xf32>
    %c0_11 = arith.constant 0 : index
    %c0_12 = arith.constant 0 : index
    %27 = vector.load %arg4[%c0_11, %c0_12] : memref<1x384xf32, #tpu.memory_space<vmem>>, vector<1x384xf32>
    %28 = vector.broadcast %27 : vector<1x384xf32> to vector<16x384xf32>
    %29 = arith.addf %26, %28 : vector<16x384xf32>
    %30 = arith.truncf %29 : vector<16x384xf32> to vector<16x384xbf16>
    %cst_13 = arith.constant 0.000000e+00 : bf16
    %31 = vector.broadcast %cst_13 : bf16 to vector<16x384xbf16>
    %32 = arith.maximumf %30, %31 : vector<16x384xbf16>
    %c0_14 = arith.constant 0 : index
    %c0_15 = arith.constant 0 : index
    %33 = vector.load %arg5[%c0_14, %c0_15] : memref<384x192xbf16, #tpu.memory_space<vmem>>, vector<384x192xbf16>
    %cst_16 = arith.constant dense<0.000000e+00> : vector<16x192xf32>
    %34 = tpu.matmul %32, %33, %cst_16 {dimension_numbers = #tpu.dot_dimension_numbers<[1], [0], [0], [1], [0, 0, 1, 1], [], []>} : vector<16x384xbf16>, vector<384x192xbf16>, vector<16x192xf32> -> vector<16x192xf32>
    %c0_17 = arith.constant 0 : index
    %c0_18 = arith.constant 0 : index
    %35 = vector.load %arg6[%c0_17, %c0_18] : memref<1x192xf32, #tpu.memory_space<vmem>>, vector<1x192xf32>
    %36 = vector.broadcast %35 : vector<1x192xf32> to vector<16x192xf32>
    %37 = arith.addf %34, %36 : vector<16x192xf32>
    %38 = arith.truncf %37 : vector<16x192xf32> to vector<16x192xbf16>
    %cst_19 = arith.constant 0.000000e+00 : bf16
    %39 = vector.broadcast %cst_19 : bf16 to vector<16x192xbf16>
    %40 = arith.maximumf %38, %39 : vector<16x192xbf16>
    %c0_20 = arith.constant 0 : index
    %c0_21 = arith.constant 0 : index
    %41 = vector.load %arg7[%c0_20, %c0_21] : memref<192x64xbf16, #tpu.memory_space<vmem>>, vector<192x64xbf16>
    %cst_22 = arith.constant dense<0.000000e+00> : vector<16x64xf32>
    %42 = tpu.matmul %40, %41, %cst_22 {dimension_numbers = #tpu.dot_dimension_numbers<[1], [0], [0], [1], [0, 0, 1, 1], [], []>} : vector<16x192xbf16>, vector<192x64xbf16>, vector<16x64xf32> -> vector<16x64xf32>
    %c0_23 = arith.constant 0 : index
    %c0_24 = arith.constant 0 : index
    %43 = vector.load %arg8[%c0_23, %c0_24] : memref<1x64xf32, #tpu.memory_space<vmem>>, vector<1x64xf32>
    %44 = vector.broadcast %43 : vector<1x64xf32> to vector<16x64xf32>
    %45 = arith.addf %42, %44 : vector<16x64xf32>
    %46 = arith.truncf %45 : vector<16x64xf32> to vector<16x64xbf16>
    %cst_25 = arith.constant 0.000000e+00 : bf16
    %47 = vector.broadcast %cst_25 : bf16 to vector<16x64xbf16>
    %48 = arith.maximumf %46, %47 : vector<16x64xbf16>
    %c0_26 = arith.constant 0 : index
    %c0_27 = arith.constant 0 : index
    %49 = vector.load %arg9[%c0_26, %c0_27] : memref<64x128xbf16, #tpu.memory_space<vmem>>, vector<64x128xbf16>
    %cst_28 = arith.constant dense<0.000000e+00> : vector<16x128xf32>
    %50 = tpu.matmul %48, %49, %cst_28 {dimension_numbers = #tpu.dot_dimension_numbers<[1], [0], [0], [1], [0, 0, 1, 1], [], []>} : vector<16x64xbf16>, vector<64x128xbf16>, vector<16x128xf32> -> vector<16x128xf32>
    %51 = vector.extract_strided_slice %50 {offsets = [0, 0], sizes = [16, 8], strides = [1, 1]} : vector<16x128xf32> to vector<16x8xf32>
    %c0_29 = arith.constant 0 : index
    %c0_30 = arith.constant 0 : index
    %52 = vector.load %arg10[%c0_29, %c0_30] : memref<1x8xf32, #tpu.memory_space<vmem>>, vector<1x8xf32>
    %53 = vector.broadcast %52 : vector<1x8xf32> to vector<16x8xf32>
    %54 = arith.addf %51, %53 : vector<16x8xf32>
    %c0_31 = arith.constant 0 : index
    %c0_32 = arith.constant 0 : index
    %55 = vector.load %arg11[%c0_31, %c0_32] : memref<16x8xf32, #tpu.memory_space<vmem>>, vector<16x8xf32>
    tpu.vector_store %arg11[%c0_31, %c0_32], %54 {strides = array<i32>} : memref<16x8xf32, #tpu.memory_space<vmem>>, vector<16x8xf32>,
    return
  }
  func.func @transform_0(%arg0: i32) -> (i32, i32) {
    %c0_i32 = arith.constant 0 : i32
    %c0_i32_0 = arith.constant 0 : i32
    return %arg0, %c0_i32 : i32, i32
  }
  func.func @transform_1(%arg0: i32) -> (i32, i32) {
    %c0_i32 = arith.constant 0 : i32
    %c0_i32_0 = arith.constant 0 : i32
    %c0_i32_1 = arith.constant 0 : i32
    return %c0_i32, %c0_i32_0 : i32, i32
  }
  func.func @transform_2(%arg0: i32) -> (i32, i32) {
    %c0_i32 = arith.constant 0 : i32
    %c0_i32_0 = arith.constant 0 : i32
    %c0_i32_1 = arith.constant 0 : i32
    return %c0_i32, %c0_i32_0 : i32, i32
  }
  func.func @transform_3(%arg0: i32) -> (i32, i32) {
    %c0_i32 = arith.constant 0 : i32
    %c0_i32_0 = arith.constant 0 : i32
    %c0_i32_1 = arith.constant 0 : i32
    return %c0_i32, %c0_i32_0 : i32, i32
  }
  func.func @transform_4(%arg0: i32) -> (i32, i32) {
    %c0_i32 = arith.constant 0 : i32
    %c0_i32_0 = arith.constant 0 : i32
    %c0_i32_1 = arith.constant 0 : i32
    return %c0_i32, %c0_i32_0 : i32, i32
  }
  func.func @transform_5(%arg0: i32) -> (i32, i32) {
    %c0_i32 = arith.constant 0 : i32
    %c0_i32_0 = arith.constant 0 : i32
    %c0_i32_1 = arith.constant 0 : i32
    return %c0_i32, %c0_i32_0 : i32, i32
  }
  func.func @transform_6(%arg0: i32) -> (i32, i32) {
    %c0_i32 = arith.constant 0 : i32
    %c0_i32_0 = arith.constant 0 : i32
    %c0_i32_1 = arith.constant 0 : i32
    return %c0_i32, %c0_i32_0 : i32, i32
  }
  func.func @transform_7(%arg0: i32) -> (i32, i32) {
    %c0_i32 = arith.constant 0 : i32
    %c0_i32_0 = arith.constant 0 : i32
    %c0_i32_1 = arith.constant 0 : i32
    return %c0_i32, %c0_i32_0 : i32, i32
  }
  func.func @transform_8(%arg0: i32) -> (i32, i32) {
    %c0_i32 = arith.constant 0 : i32
    %c0_i32_0 = arith.constant 0 : i32
    %c0_i32_1 = arith.constant 0 : i32
    return %c0_i32, %c0_i32_0 : i32, i32
  }
  func.func @transform_9(%arg0: i32) -> (i32, i32) {
    %c0_i32 = arith.constant 0 : i32
    %c0_i32_0 = arith.constant 0 : i32
    %c0_i32_1 = arith.constant 0 : i32
    return %c0_i32, %c0_i32_0 : i32, i32
  }
  func.func @transform_10(%arg0: i32) -> (i32, i32) {
    %c0_i32 = arith.constant 0 : i32
    %c0_i32_0 = arith.constant 0 : i32
    return %arg0, %c0_i32 : i32, i32
  }
}

</mosaic_0001>

<bundles_post_ra>
// kernel: tpu_custom_call.1
= control target key start
LH: loop header
LB: loop body
LE: loop exit
PB: predicated region body
PF: predicated region fallthrough
CT: control target
= control target key end

     0   :  { %vm80_vm0 = vcmask 1044480   ;;  %vm81_vm1 = vcmask 1045504   ;;  %v1125_v1 = vmov 65535   ;;  %v1126_v3 = vmov 0   ;;  %s1499_s1 = inlined_call_operand.vmem [shape: bf16[27,384], index: 1, kind: input, shape index: {}]   ;;  %s1500_s0 = inlined_call_operand.vmem [shape: f32[16,27], index: 0, kind: input, shape index: {}]   ;;  %s1501_s4 = inlined_call_operand.vmem [shape: bf16[384,192], index: 4, kind: input, shape index: {}]   ;;  %s1502_s6 = inlined_call_operand.vmem [shape: bf16[192,64], index: 6, kind: input, shape index: {}]   ;;  %s1503_s2 = inlined_call_operand.vmem [shape: f32[1,384], index: 2, kind: input, shape index: {}]   ;;  %s1504_s3 = inlined_call_operand.vmem [shape: f32[1,384], index: 3, kind: input, shape index: {}]   ;;  %s1505_s8 = inlined_call_operand.vmem [shape: bf16[64,128], index: 8, kind: input, shape index: {}]   ;;  %s1506_s5 = inlined_call_operand.vmem [shape: f32[1,192], index: 5, kind: input, shape index: {}]   ;;  %s1507_s7 = inlined_call_operand.vmem [shape: f32[1,64], index: 7, kind: input, shape index: {}]   ;;  %s1508_s9 = inlined_call_operand.vmem [shape: f32[1,8], index: 9, kind: input, shape index: {}]   ;;  %s1509_s10 = inlined_call_operand.vmem [shape: f32[16,8], index: 10, kind: output, shape index: {}]  }
   0x1   :  { %v1025_v0 = vld [vmem:[%s1499_s1 + $0x4] ss:$12 sps:$4 sm:$0xff]   ;;  %v82_v2 = vsel %vm80_vm0, 4294967295, %v1125_v1  ;;  %125 = vmatprep.mubr.bf16.mxu1 %v1126_v3  ;;  %v1027_v4 = vld [vmem:[%s1499_s1] ss:$12 sps:$4 sm:$0xff]   ;;  %vm76_vm2 = vcmask 220160  }
   0x2   :  { %v83_v5 = vsel %vm81_vm1, %v82_v2, 0  ;;  %93 = vmatprep.subr.bf16.mxu1 %v1025_v0  ;;  %v1028_v6 = vld [vmem:[%s1499_s1 + $0x1c] ss:$12 sps:$4 sm:$0x3f]   ;;  %v36_v8 = vld [vmem:[%s1500_s0] sm:$0xff]  ;;  %v1127_v15 = vmov 0.0  }
   0x3   :  { %v1030_v7 = vld [vmem:[%s1499_s1 + $0x18] ss:$12 sps:$4 sm:$0x3f]   ;;  %94 = vmatpush1.bf16.msra.mxu1 %v1027_v4  ;;  %v37_v9 = vld [vmem:[%s1500_s0 + $0x8] sm:$0xff]  ;;  %v88_v10 = vand.u32 %v1028_v6, %v83_v5  ;;  %vm1128_vm3 = vmmov 0   ;;  %vm770_vm4 = vcmask 523264  }
   0x4   :  { %v85_v11 = vand.u32 %v1030_v7, %v83_v5  ;;  %v38_v12 = vpack.c.bf16 %v37_v9, %v36_v8  ;;  %v1031_v13 = vld [vmem:[%s1499_s1 + $0x8] ss:$12 sps:$4 sm:$0xff]   ;;  %v1032_v14 = vld [vmem:[%s1499_s1 + $0x20] ss:$12 sps:$4 sm:$0x3f]   ;;  %vm902_vm5 = vcmask 64512  }
   0x5   :  { %95 = vmatprep.subr.bf16.mxu1 %v88_v10  ;;  %v91_v16 = vand.u32 %v1032_v14, %v83_v5  ;;  %v1033_v17 = vld [vmem:[%s1501_s4 + $0x4] ss:$8 sps:$4 sm:$0xff]   ;;  %v1035_v18 = vld [vmem:[%s1501_s4] ss:$8 sps:$4 sm:$0xff]   ;;  %v1036_v19 = vld [vmem:[%s1501_s4 + $0x14] ss:$8 sps:$4 sm:$0xff]  }
   0x6   :  { %577 = vmatprep.subr.bf16.mxu0 %v1033_v17  ;;  %v1038_v20 = vld [vmem:[%s1501_s4 + $0x10] ss:$8 sps:$4 sm:$0xff]   ;;  %v1039_v21 = vld [vmem:[%s1501_s4 + $0x24] ss:$8 sps:$4 sm:$0xff]   ;;  %v1041_v22 = vld [vmem:[%s1501_s4 + $0x20] ss:$8 sps:$4 sm:$0xff]  }
   0x7   :  { %96 = vmatpush1.bf16.msra.mxu1 %v85_v11  ;;  %578 = vmatpush1.bf16.msra.mxu0 %v1035_v18  ;;  %v1042_v23 = vld [vmem:[%s1501_s4 + $0x34] ss:$8 sps:$4 sm:$0xff]   ;;  %v1044_v24 = vld [vmem:[%s1501_s4 + $0x30] ss:$8 sps:$4 sm:$0xff]   ;;  %v1045_v25 = vld [vmem:[%s1501_s4 + $0x44] ss:$8 sps:$4 sm:$0xff]  }
   0x8   :  { %993 = vmatprep.subr.bf16.mxu1 %v1127_v15  ;;  %579 = vmatprep.subr.bf16.mxu0 %v1036_v19  ;;  %v1047_v26 = vld [vmem:[%s1501_s4 + $0x40] ss:$8 sps:$4 sm:$0xff]   ;;  %v1048_v27 = vld [vmem:[%s1501_s4 + $0x54] ss:$8 sps:$4 sm:$0xff]   ;;  %v1050_v28 = vld [vmem:[%s1501_s4 + $0x50] ss:$8 sps:$4 sm:$0xff]  }
   0x9   :  { %v1051_v29 = vld [vmem:[%s1501_s4 + $0x64] ss:$8 sps:$4 sm:$0xff]   ;;  %v1053_v30 = vld [vmem:[%s1501_s4 + $0x60] ss:$8 sps:$4 sm:$0xff]   ;;  %v1054_v31 = vld [vmem:[%s1501_s4 + $0x74] ss:$8 sps:$4 sm:$0xff]  }
   0xa   :  { %915 = vmatmul.mubr.msk.bf16.vlgmr.msra.gmra.mrb[0].mxu1 %vm76_vm2, %v38_v12  ;;  %v1056_v54 = vld [vmem:[%s1501_s4 + $0x70] ss:$8 sps:$4 sm:$0xff]   ;;  %v1057_v55 = vld [vmem:[%s1501_s4 + $0x84] ss:$8 sps:$4 sm:$0xff]   ;;  %v1059_v56 = vld [vmem:[%s1501_s4 + $0x80] ss:$8 sps:$4 sm:$0xff]  }
   0xb   :  { %994 = vmatpush3.bf16.msra.mxu1 %v1031_v13  ;;  %997 = vmatprep.mubr.msk.bf16.mxu1 %vm1128_vm3, %v1127_v15  ;;  %v1060_v57 = vld [vmem:[%s1501_s4 + $0x94] ss:$8 sps:$4 sm:$0xff]   ;;  %v1062_v58 = vld [vmem:[%s1501_s4 + $0x90] ss:$8 sps:$4 sm:$0xff]   ;;  %v1063_v59 = vld [vmem:[%s1501_s4 + $0xa4] ss:$8 sps:$4 sm:$0xff]  }
   0xc   :  { %995 = vmatprep.subr.bf16.mxu1 %v1127_v15  ;;  %580 = vmatpush1.bf16.msra.mxu0 %v1038_v20  ;;  %v1065_v60 = vld [vmem:[%s1501_s4 + $0xa0] ss:$8 sps:$4 sm:$0xff]   ;;  %v1066_v61 = vld [vmem:[%s1501_s4 + $0xb4] ss:$8 sps:$4 sm:$0xff]   ;;  %v1068_v62 = vld [vmem:[%s1501_s4 + $0xb0] ss:$8 sps:$4 sm:$0xff]  }
   0xd   :  { %581 = vmatprep.subr.bf16.mxu0 %v1039_v21  ;;  %v1069_v63 = vld [vmem:[%s1501_s4 + $0xc4] ss:$8 sps:$4 sm:$0xff]   ;;  %v1071_v0 = vld [vmem:[%s1501_s4 + $0xc0] ss:$8 sps:$4 sm:$0xff]   ;;  %v1072_v1 = vld [vmem:[%s1501_s4 + $0xd4] ss:$8 sps:$4 sm:$0xff]  }
   0xe   :  { %v1074_v2 = vld [vmem:[%s1501_s4 + $0xd0] ss:$8 sps:$4 sm:$0xff]   ;;  %v1075_v4 = vld [vmem:[%s1501_s4 + $0xe4] ss:$8 sps:$4 sm:$0xff]   ;;  %v1077_v5 = vld [vmem:[%s1501_s4 + $0xe0] ss:$8 sps:$4 sm:$0xff]  }
   0xf   :  { %996 = vmatpush3.bf16.msra.mxu1 %v91_v16  ;;  %v1078_v6 = vld [vmem:[%s1501_s4 + $0xf4] ss:$8 sps:$4 sm:$0xff]   ;;  %v1080_v7 = vld [vmem:[%s1501_s4 + $0xf0] ss:$8 sps:$4 sm:$0xff]   ;;  %v1083_v8 = vld [vmem:[%s1501_s4 + $0x104] ss:$8 sps:$4 sm:$0xff]  }
  0x10   :  { %774 = vmatprep.subr.bf16.mxu1 %v1126_v3  ;;  %582 = vmatpush1.bf16.msra.mxu0 %v1041_v22  ;;  %v1105_v9 = vld [vmem:[%s1502_s6] sm:$0xff]   ;;  %v1106_v10 = vld [vmem:[%s1502_s6 + $0x8] sm:$0xff]   ;;  %v1107_v11 = vld [vmem:[%s1502_s6 + $0x10] sm:$0xff]  }
  0x11   :  { %583 = vmatprep.subr.bf16.mxu0 %v1042_v23  ;;  %v1109_v13 = vld [vmem:[%s1502_s6 + $0x20] sm:$0xff]   ;;  %v1110_v14 = vld [vmem:[%s1502_s6 + $0x28] sm:$0xff]   ;;  %v1111_v16 = vld [vmem:[%s1502_s6 + $0x30] sm:$0xff]  }
  0x12   :  { %998 = vmatmul.mubr.msk.bf16.vlgmr.msra.gmra.mrb[4].mxu1 %vm76_vm2, %v38_v12  ;;  %v1108_v12 = vld [vmem:[%s1502_s6 + $0x18] sm:$0xff]   ;;  %v1113_v18 = vld [vmem:[%s1502_s6 + $0x40] sm:$0xff]  }
  0x13   :  { %775 = vmatpush1.bf16.msra.mxu1 %v1105_v9  ;;  %v1112_v17 = vld [vmem:[%s1502_s6 + $0x38] sm:$0xff]  }
  0x14   :  { %584 = vmatpush1.bf16.msra.mxu0 %v1044_v24  ;;  %776 = vmatprep.subr.bf16.mxu1 %v1126_v3 }
  0x15   :  { %585 = vmatprep.subr.bf16.mxu0 %v1045_v25 }
  0x17   :  { %777 = vmatpush1.bf16.msra.mxu1 %v1106_v10 }
  0x18   :  { %586 = vmatpush1.bf16.msra.mxu0 %v1047_v26  ;;  %778 = vmatprep.subr.bf16.mxu1 %v1126_v3 }
  0x19   :  { %587 = vmatprep.subr.bf16.mxu0 %v1048_v27 }
  0x1b   :  { %779 = vmatpush1.bf16.msra.mxu1 %v1107_v11 }
  0x1c   :  { %588 = vmatpush1.bf16.msra.mxu0 %v1050_v28  ;;  %780 = vmatprep.subr.bf16.mxu1 %v1126_v3 }
  0x1d   :  { %589 = vmatprep.subr.bf16.mxu0 %v1051_v29 }
  0x1f   :  { %781 = vmatpush1.bf16.msra.mxu1 %v1108_v12 }
  0x20   :  { %590 = vmatpush1.bf16.msra.mxu0 %v1053_v30  ;;  %782 = vmatprep.subr.bf16.mxu1 %v1126_v3 }
  0x21   :  { %591 = vmatprep.subr.bf16.mxu0 %v1054_v31 }
  0x23   :  { %783 = vmatpush1.bf16.msra.mxu1 %v1109_v13 }
  0x24   :  { %592 = vmatpush1.bf16.msra.mxu0 %v1056_v54  ;;  %784 = vmatprep.subr.bf16.mxu1 %v1126_v3 }
  0x25   :  { %593 = vmatprep.subr.bf16.mxu0 %v1057_v55 }
  0x27   :  { %785 = vmatpush1.bf16.msra.mxu1 %v1110_v14 }
  0x28   :  { %594 = vmatpush1.bf16.msra.mxu0 %v1059_v56  ;;  %786 = vmatprep.subr.bf16.mxu1 %v1126_v3 }
  0x29   :  { %595 = vmatprep.subr.bf16.mxu0 %v1060_v57 }
  0x2b   :  { %787 = vmatpush1.bf16.msra.mxu1 %v1111_v16  ;;  %v1081_v16 = vld [vmem:[%s1501_s4 + $0x100] ss:$8 sps:$4 sm:$0xff]  }
  0x2c   :  { %596 = vmatpush1.bf16.msra.mxu0 %v1062_v58  ;;  %788 = vmatprep.subr.bf16.mxu1 %v1126_v3 }
  0x2d   :  { %597 = vmatprep.subr.bf16.mxu0 %v1063_v59 }
  0x2f   :  { %789 = vmatpush1.bf16.msra.mxu1 %v1112_v17 }
  0x30   :  { %598 = vmatpush1.bf16.msra.mxu0 %v1065_v60  ;;  %790 = vmatprep.subr.bf16.mxu1 %v1126_v3 }
  0x31   :  { %599 = vmatprep.subr.bf16.mxu0 %v1066_v61 }
  0x33   :  { %791 = vmatpush1.bf16.msra.mxu1 %v1113_v18  ;;  %v1086_v18 = vld [vmem:[%s1501_s4 + $0x114] ss:$8 sps:$4 sm:$0xff]  }
  0x34   :  { %600 = vmatpush1.bf16.msra.mxu0 %v1068_v62  ;;  %792 = vmatprep.subr.bf16.mxu1 %v1126_v3 }
  0x35   :  { %601 = vmatprep.subr.bf16.mxu0 %v1069_v63 }
  0x38   :  { %602 = vmatpush1.bf16.msra.mxu0 %v1071_v0 }
  0x39   :  { %603 = vmatprep.subr.bf16.mxu0 %v1072_v1 }
  0x3c   :  { %604 = vmatpush1.bf16.msra.mxu0 %v1074_v2 }
  0x3d   :  { %605 = vmatprep.subr.bf16.mxu0 %v1075_v4 }
  0x40   :  { %606 = vmatpush1.bf16.msra.mxu0 %v1077_v5 }
  0x41   :  { %607 = vmatprep.subr.bf16.mxu0 %v1078_v6 }
  0x44   :  { %608 = vmatpush1.bf16.msra.mxu0 %v1080_v7 }
  0x45   :  { %620 = vmatprep.subr.bf16.mxu0 %v1083_v8 }
  0xdd   :  { %v1259_v32 = vpop.f32.mrb[0].mxu1 }
  0xde   :  { %v187_v33 = vmul.f32 %v1259_v32, %v1259_v32  ;;  %v1263_v34 = vpop.f32.mrb[1].mxu1 }
  0xdf   :  { %v188_v35 = vmul.f32 %v1263_v34, %v1263_v34  ;;  %v1267_v36 = vpop.f32.mrb[2].mxu1  ;;  %v177_v37 = vadd.f32 %v1263_v34, %v1259_v32 }
  0xe0   :  { %v190_v38 = vmul.f32 %v1267_v36, %v1267_v36  ;;  %v1273_v39 = vpop.f32.mrb[3].mxu1 }
  0xe1   :  { %v191_v40 = vmul.f32 %v1273_v39, %v1273_v39  ;;  %v193_v41 = vadd.f32 %v188_v35, %v187_v33  ;;  %v181_v42 = vadd.f32 %v1273_v39, %v1267_v36  ;;  %v227_v35 = vlaneseq }
  0xe3   :  { %v197_v43 = vadd.f32 %v191_v40, %v190_v38  ;;  %v228_v40 = vshrl.u32 %v227_v35, 7  ;;  %v1114_v35 = vld [vmem:[%s1502_s6 + $0x48] sm:$0xff]  }
  0xe4   :  { %793 = vmatpush1.bf16.msra.mxu1 %v1114_v35 }
  0xe5   :  { %v1279_v44 = vpop.f32.mrb[4].mxu1  ;;  %794 = vmatprep.subr.bf16.mxu1 %v1126_v3 }
  0xe6   :  { %v999_v45 = vpop.f32.mrb[5].mxu1  ;;  %v178_v46 = vadd.f32 %v177_v37, %v1279_v44  ;;  %v189_v47 = vmul.f32 %v1279_v44, %v1279_v44 }
  0xe7   :  { %v1284_v48 = vpop.f32.mrb[6].mxu1  ;;  %v237_v45 = vsub.s32 2, %v228_v40 }
  0xe8   :  { %179 = vadd.xlane.f32.xlu0 %v178_v46  ;;  %v1000_v49 = vpop.f32.mrb[7].mxu1  ;;  %v194_v50 = vadd.f32 %v193_v41, %v189_v47  ;;  %v182_v51 = vadd.f32 %v181_v42, %v1284_v48  ;;  %v192_v52 = vmul.f32 %v1284_v48, %v1284_v48  ;;  %v1379_v41 = vsub.s32 1, %v228_v40 }
  0xe9   :  { %v1381_v42 = vsub.s32 0, %v228_v40  ;;  %v325_v40 = vld [vmem:[%s1506_s5] sm:$0x3] }
  0xea   :  { %195 = vadd.xlane.f32.xlu1 %v194_v50  ;;  %v198_v53 = vadd.f32 %v197_v43, %v192_v52  ;;  %v225_v43 = vld [vmem:[%s1503_s2] sm:$0x7] }
  0xeb   :  { %v234_v52 = vrot.slane %v225_v43, %v1379_v41  ;;  %v230_v55 = vrot.slane %v225_v43, %v1381_v42  ;;  %v238_v56 = vrot.slane %v225_v43, %v237_v45  ;;  %v330_v43 = vrot.slane %v325_v40, %v1381_v42 }
  0xec   :  { %183 = vadd.xlane.f32.xlu0 %v182_v51 }
  0xee   :  { %199 = vadd.xlane.f32.xlu1 %v198_v53  ;;  %v248_v53 = vld [vmem:[%s1504_s3] sm:$0x7] }
  0xef   :  { %v253_v60 = vrot.slane %v248_v53, %v1381_v42  ;;  %v261_v1 = vrot.slane %v248_v53, %v237_v45 }
 0x175   :  { %v180_v19 = vpop.xlane.xlu0 %179 }
 0x176   :  { %v185_v20 = vmul.f32 0.0026041667, %v180_v19  ;;  %v1084_v19 = vld [vmem:[%s1501_s4 + $0x110] ss:$8 sps:$4 sm:$0xff]  }
 0x177   :  { %v196_v21 = vpop.xlane.xlu1 %195 }
 0x178   :  { %v201_v22 = vmul.f32 0.0026041667, %v196_v21  ;;  %v203_v23 = vmul.f32 %v185_v20, %v185_v20  ;;  %v213_v46 = vsub.f32 %v1259_v32, %v185_v20  ;;  %v214_v47 = vsub.f32 %v1263_v34, %v185_v20  ;;  %v1087_v21 = vld [vmem:[%s1501_s4 + $0x120] ss:$8 sps:$4 sm:$0xff]  }
 0x179   :  { %v184_v24 = vpop.xlane.xlu0 %183  ;;  %v215_v50 = vsub.f32 %v1279_v44, %v185_v20  ;;  %v257_v44 = vrot.slane %v248_v53, %v1379_v41  ;;  %v1089_v20 = vld [vmem:[%s1501_s4 + $0x124] ss:$8 sps:$4 sm:$0xff]  }
 0x17a   :  { %v186_v25 = vmul.f32 0.0026041667, %v184_v24  ;;  %v205_v26 = vsub.f32 %v201_v22, %v203_v23  ;;  %v1092_v22 = vld [vmem:[%s1501_s4 + $0x134] ss:$8 sps:$4 sm:$0xff]   ;;  %v1090_v23 = vld [vmem:[%s1501_s4 + $0x130] ss:$8 sps:$4 sm:$0xff]  }
 0x17b   :  { %v200_v27 = vpop.xlane.xlu1 %199  ;;  %v1095_v24 = vld [vmem:[%s1501_s4 + $0x144] ss:$8 sps:$4 sm:$0xff]  }
 0x17c   :  { %v202_v28 = vmul.f32 0.0026041667, %v200_v27  ;;  %v207_v29 = vmax.f32 %v205_v26, 0.0  ;;  %v204_v30 = vmul.f32 %v186_v25, %v186_v25  ;;  %v216_v58 = vsub.f32 %v1267_v36, %v186_v25  ;;  %v1098_v26 = vld [vmem:[%s1501_s4 + $0x154] ss:$8 sps:$4 sm:$0xff]  }
 0x17d   :  { %v217_v32 = vsub.f32 %v1273_v39, %v186_v25  ;;  %v218_v59 = vsub.f32 %v1284_v48, %v186_v25  ;;  %v1093_v25 = vld [vmem:[%s1501_s4 + $0x140] ss:$8 sps:$4 sm:$0xff]   ;;  %v1096_v27 = vld [vmem:[%s1501_s4 + $0x150] ss:$8 sps:$4 sm:$0xff]  }
 0x17e   :  { %v209_v31 = vadd.f32 1e-05, %v207_v29  ;;  %v206_v33 = vsub.f32 %v202_v28, %v204_v30  ;;  %v1101_v28 = vld [vmem:[%s1501_s4 + $0x164] ss:$8 sps:$4 sm:$0xff]   ;;  %v1099_v29 = vld [vmem:[%s1501_s4 + $0x160] ss:$8 sps:$4 sm:$0xff]  }
 0x17f   :  { %v1104_v30 = vld [vmem:[%s1501_s4 + $0x174] ss:$8 sps:$4 sm:$0xff]  }
 0x180   :  { %1121 = vrsqrt.f32 %v209_v31  ;;  %v208_v37 = vmax.f32 %v206_v33, 0.0  ;;  %v1102_v31 = vld [vmem:[%s1501_s4 + $0x170] ss:$8 sps:$4 sm:$0xff]  }
 0x182   :  { %v210_v38 = vadd.f32 1e-05, %v208_v37  ;;  %v1115_v37 = vld [vmem:[%s1502_s6 + $0x50] sm:$0xff]  }
 0x183   :  { %795 = vmatpush1.bf16.msra.mxu1 %v1115_v37 }
 0x184   :  { %1123 = vrsqrt.f32 %v210_v38  ;;  %796 = vmatprep.subr.bf16.mxu1 %v1126_v3  ;;  %v1116_v38 = vld [vmem:[%s1502_s6 + $0x58] sm:$0xff]  }
 0x187   :  { %797 = vmatpush1.bf16.msra.mxu1 %v1116_v38 }
 0x188   :  { %1001 = vmatprep.subr.bf16.mxu1 %v1127_v15 }
 0x18a   :  { %v1122_v49 = vpop.eup %1121 }
 0x18b   :  { %v220_v51 = vmul.f32 %v1122_v49, %v214_v47  ;;  %v219_v54 = vmul.f32 %v1122_v49, %v213_v46  ;;  %v221_v57 = vmul.f32 %v1122_v49, %v215_v50  ;;  %v334_v46 = vrot.slane %v325_v40, %v1379_v41  ;;  %v1118_v41 = vld [vmem:[%s1505_s8 + $0x8] sm:$0xff]  }
 0x18d   :  { %v243_v62 = vmul.f32 %v234_v52, %v220_v51  ;;  %v242_v0 = vmul.f32 %v230_v55, %v219_v54  ;;  %v244_v4 = vmul.f32 %v238_v56, %v221_v57 }
 0x18e   :  { %v1124_v34 = vpop.eup %1123 }
 0x18f   :  { %v223_v61 = vmul.f32 %v1124_v34, %v217_v32  ;;  %v222_v63 = vmul.f32 %v1124_v34, %v216_v58  ;;  %v224_v2 = vmul.f32 %v1124_v34, %v218_v59  ;;  %v266_v36 = vadd.f32 %v257_v44, %v243_v62  ;;  %v1117_v58 = vld [vmem:[%s1505_s8] sm:$0xff]   ;;  %v1119_v32 = vld [vmem:[%s1505_s8 + $0x10] sm:$0xff]   ;;  %v1120_v34 = vld [vmem:[%s1505_s8 + $0x18] sm:$0xff]  }
 0x190   :  { %v265_v39 = vadd.f32 %v253_v60, %v242_v0  ;;  %v267_v10 = vadd.f32 %v261_v1, %v244_v4  ;;  %v965_v59 = vld [vmem:[%s1507_s7] ss:$0 sm:$0xff] }
 0x191   :  { %v246_v5 = vmul.f32 %v234_v52, %v223_v61  ;;  %v245_v6 = vmul.f32 %v230_v55, %v222_v63  ;;  %v247_v7 = vmul.f32 %v238_v56, %v224_v2 }
 0x193   :  { %v269_v8 = vadd.f32 %v257_v44, %v246_v5  ;;  %v268_v9 = vadd.f32 %v253_v60, %v245_v6  ;;  %v270_v48 = vadd.f32 %v261_v1, %v247_v7 }
 0x195   :  { %v272_v11 = vpack.c.bf16 %v269_v8, %v266_v36  ;;  %v271_v12 = vpack.c.bf16 %v268_v9, %v265_v39  ;;  %v273_v13 = vpack.c.bf16 %v270_v48, %v267_v10 }
 0x197   :  { %v275_v14 = vmax.bf16 %v1126_v3, %v272_v11  ;;  %v274_v17 = vmax.bf16 %v1126_v3, %v271_v12  ;;  %v276_v33 = vmax.bf16 %v1126_v3, %v273_v13 }
 0x199   :  { %609 = vmatprep.mubr.bf16.mxu0 %v275_v14 }
 0x19a   :  { %610 = vmatmul.mubr.bf16.vlgmr.msra.gmra.mrb[0].mxu0 %v274_v17 }
 0x19b   :  { %621 = vmatpush1.bf16.msra.mxu0 %v1081_v16  ;;  %652 = vmatprep.mubr.bf16.mxu0 %v1126_v3 }
 0x19c   :  { %622 = vmatprep.subr.bf16.mxu0 %v1086_v18 }
 0x19f   :  { %623 = vmatpush1.bf16.msra.mxu0 %v1084_v19 }
 0x1a0   :  { %624 = vmatprep.subr.bf16.mxu0 %v1089_v20 }
 0x1a3   :  { %625 = vmatpush1.bf16.msra.mxu0 %v1087_v21 }
 0x1a4   :  { %626 = vmatprep.subr.bf16.mxu0 %v1092_v22 }
 0x1a7   :  { %627 = vmatpush1.bf16.msra.mxu0 %v1090_v23 }
 0x1a8   :  { %628 = vmatprep.subr.bf16.mxu0 %v1095_v24 }
 0x1ab   :  { %629 = vmatpush1.bf16.msra.mxu0 %v1093_v25 }
 0x1ac   :  { %630 = vmatprep.subr.bf16.mxu0 %v1098_v26 }
 0x1af   :  { %631 = vmatpush1.bf16.msra.mxu0 %v1096_v27 }
 0x1b0   :  { %632 = vmatprep.subr.bf16.mxu0 %v1101_v28 }
 0x1b3   :  { %633 = vmatpush1.bf16.msra.mxu0 %v1099_v29 }
 0x1b4   :  { %634 = vmatprep.subr.bf16.mxu0 %v1104_v30 }
 0x1b7   :  { %635 = vmatpush1.bf16.msra.mxu0 %v1102_v31 }
 0x1ba   :  { %653 = vmatmul.mubr.bf16.vlgmr.msra.gmra.mrb[0].mxu0 %v276_v33 }
 0x28d   :  { %v654_v45 = vpop.f32.mrb[0].mxu0 }
 0x28e   :  { %v1013_v47 = vadd.f32 %v654_v45, %v330_v43  ;;  %v656_v49 = vpop.f32.mrb[1].mxu0 }
 0x28f   :  { %v658_v50 = vpop.f32.mrb[2].mxu0  ;;  %v1014_v53 = vadd.f32 %v656_v49, %v334_v46 }
 0x290   :  { %v1015_v51 = vadd.f32 %v658_v50, %v330_v43  ;;  %v660_v52 = vpop.f32.mrb[3].mxu0 }
 0x291   :  { %v1016_v54 = vadd.f32 %v660_v52, %v334_v46 }
 0x292   :  { %v663_v55 = vpack.c.bf16 %v1015_v51, %v1013_v47 }
 0x293   :  { %v664_v56 = vpack.c.bf16 %v1016_v54, %v1014_v53 }
 0x294   :  { %v665_v42 = vmax.bf16 %v1126_v3, %v663_v55 }
 0x295   :  { %v666_v57 = vmax.bf16 %v1126_v3, %v664_v56 }
 0x297   :  { %978 = vmatprep.mubr.msk.bf16.mxu1 %vm770_vm4, %v666_v57 }
 0x298   :  { %807 = vmatmul.mubr.bf16.vlgmr.msra.gmra.mrb[8].mxu1 %v665_v42 }
 0x299   :  { %1002 = vmatpush3.bf16.msra.mxu1 %v1117_v58  ;;  %1009 = vmatprep.mubr.msk.bf16.mxu1 %vm1128_vm3, %v1127_v15 }
 0x29a   :  { %1003 = vmatprep.subr.bf16.mxu1 %v1127_v15 }
 0x29d   :  { %1004 = vmatpush3.bf16.msra.mxu1 %v1118_v41 }
 0x29e   :  { %1005 = vmatprep.subr.bf16.mxu1 %v1127_v15 }
 0x2a1   :  { %1006 = vmatpush3.bf16.msra.mxu1 %v1119_v32 }
 0x2a2   :  { %1007 = vmatprep.subr.bf16.mxu1 %v1127_v15  ;;  %v984_v15 = vld [vmem:[%s1508_s9] ss:$0 sm:$0xff] }
 0x2a5   :  { %1008 = vmatpush3.bf16.msra.mxu1 %v1120_v34 }
 0x36b   :  { %v808_v44 = vpop.f32.mrb[8].mxu1 }
 0x36c   :  { %v810_v60 = vpop.f32.mrb[9].mxu1  ;;  %v809_v62 = vadd.f32 %v965_v59, %v808_v44 }
 0x36d   :  { %v811_v61 = vpop.f32.mrb[10].mxu1 }
 0x36e   :  { %v812_v63 = vadd.f32 %v965_v59, %v811_v61  ;;  %v813_v0 = vpop.f32.mrb[11].mxu1 }
 0x370   :  { %v815_v1 = vpack.c.bf16 %v812_v63, %v809_v62 }
 0x372   :  { %v816_v2 = vmax.bf16 %v1126_v3, %v815_v1 }
 0x374   :  { %1010 = vmatmul.mubr.msk.bf16.vlgmr.msra.gmra.mrb[12].mxu1 %vm770_vm4, %v816_v2 }
 0x447   :  { %v886_v4 = vpop.f32.mrb[12].mxu1 }
 0x448   :  { %v900_v5 = vadd.f32 %v984_v15, %v886_v4  ;;  %v1011_v6 = vpop.f32.mrb[13].mxu1 }
 0x449   :  { %v889_v7 = vpop.f32.mrb[14].mxu1 }
 0x44a   :  { %903 = vst.msk [vmem:[%s1509_s10] sm:$0xff] %vm902_vm5, %v900_v5  ;;  %v901_v36 = vadd.f32 %v984_v15, %v889_v7  ;;  %v1012_v8 = vpop.f32.mrb[15].mxu1 }
 0x44c   :  { %904 = vst.msk [vmem:[%s1509_s10 + $0x8] sm:$0xff] %vm902_vm5, %v901_v36 }

</bundles_post_ra>
